<compile_context>
chip_gen: v5e
topology: v5e:2x2
jax: 0.10.0
libtpu: 0.0.40
codegen_flags: <defaults>
</compile_context>

<pallas_src>
import jax
import jax.numpy as jnp
from jax import lax
from jax.experimental import pallas as pl
from jax.experimental.pallas import tpu as pltpu


def _round_up(a, b):
    return (a + b - 1) // b * b


def _moe_kernel(step_expert_ref, step_tile_ref, step_mode_ref,
                x_ref, w_ref, b_ref, meta_ref, out_ref):
    """One grid step = one (token-tile, expert) pair of the grouped schedule.

    step_mode: 0 = padding step (skip), 1 = first visit of this output tile (write),
               2 = revisit (accumulate).
    """
    s = pl.program_id(0)
    mode = step_mode_ref[s]

    @pl.when(mode > 0)
    def _():
        # Single-expert matmul: (tm, D) bf16 @ (D, D) bf16 -> (tm, D) f32 on the MXU.
        y = jnp.dot(x_ref[...], w_ref[...], preferred_element_type=jnp.float32)
        y = y + b_ref[...]                                   # f32 bias, (1, D)

        # Rows belonging to this step's expert keep their probability weight,
        # all other rows are zeroed.  Select on a (tm, 1) column, then one
        # broadcast multiply over (tm, D).
        e_f = step_expert_ref[s].astype(jnp.float32)
        scale = jnp.where(meta_ref[:, 0:1] == e_f, meta_ref[:, 1:2], 0.0)
        y = y * scale

        @pl.when(mode == 1)
        def _():
            out_ref[...] = y.astype(out_ref.dtype)

        @pl.when(mode == 2)
        def _():
            out_ref[...] = out_ref[...] + y.astype(out_ref.dtype)


def topk_moe(x, wr, br, we, be, *, k, token_tile=256):
    """x: (B,T,D) f32; wr: (D,E); br: (1,E); we: (E,D,D); be: (E,1,D)."""
    B, T, D = x.shape
    E = wr.shape[1]
    N = B * T
    xf = x.reshape(N, D)

    # ---------- router (plain XLA, f32; identical semantics to the PyTorch module) ----
    logits = xf @ wr + br                                    # (N, E)
    probs = jax.nn.softmax(logits, axis=-1)
    _, topk_idx = lax.top_k(probs, k)                        # ties -> lower index
    sel = jnp.any(topk_idx[:, :, None] == jnp.arange(E)[None, None, :], axis=1)
    # "out[mask] = ..." in the reference overwrites: the LAST selected expert wins.
    istar = jnp.max(jnp.where(sel, jnp.arange(E)[None, :], -1), axis=-1)  # (N,)
    wprob = jnp.take_along_axis(probs, istar[:, None], axis=-1)[:, 0]     # (N,)

    # ---------- tile sizes ----------
    tm = min(token_tile, _round_up(N, 16))
    tm = _round_up(tm, 16)                                   # bf16 sublane packing
    Np = _round_up(N, tm)
    pad = Np - N
    tiles = Np // tm
    S = tiles + E - 1                                        # static step upper bound

    # ---------- grouped dispatch: sort tokens by winning expert ----------
    if pad:
        istar_p = jnp.concatenate([istar, jnp.full((pad,), E - 1, istar.dtype)])
        wprob_p = jnp.concatenate([wprob, jnp.zeros((pad,), wprob.dtype)])
    else:
        istar_p, wprob_p = istar, wprob
    order = jnp.argsort(istar_p)                             # (Np,)
    # Gather + bf16 cast in one fused XLA pass; pad slots reuse row 0 (discarded later).
    xs = xf[jnp.minimum(order, N - 1)].astype(jnp.bfloat16)  # (Np, D)
    meta = jnp.stack([istar_p[order].astype(jnp.float32),
                      wprob_p[order].astype(jnp.float32)], axis=-1)       # (Np, 2)

    # ---------- static-size step schedule (goes to SMEM via scalar prefetch) ----------
    counts = jnp.bincount(istar_p, length=E)                 # tokens per expert (Np total)
    starts = jnp.concatenate([jnp.zeros((1,), counts.dtype), jnp.cumsum(counts)])
    ends = starts[1:]                                        # (E,)
    first_tile = starts[:E] // tm
    last_tile = jnp.where(counts > 0, (ends - 1) // tm, first_tile - 1)
    ntiles_e = jnp.maximum(last_tile - first_tile + 1, 0)    # tiles touched per expert
    step_start = jnp.concatenate([jnp.zeros((1,), ntiles_e.dtype), jnp.cumsum(ntiles_e)])
    total = step_start[E]                                    # real steps (dynamic, <= S)

    s_idx = jnp.arange(S)
    e_raw = jnp.clip(jnp.sum(step_start[1:, None] <= s_idx[None, :], axis=0), 0, E - 1)
    t_raw = first_tile[e_raw] + (s_idx - step_start[e_raw])
    valid = s_idx < total
    last = jnp.maximum(total - 1, 0)
    # Padding steps repeat the last valid indices -> no extra DMA, compute skipped.
    step_expert = jnp.where(valid, e_raw, e_raw[last]).astype(jnp.int32)
    step_tile = jnp.where(valid, t_raw, t_raw[last]).astype(jnp.int32)
    prev_tile = jnp.concatenate([jnp.full((1,), -1, step_tile.dtype), step_tile[:-1]])
    step_mode = jnp.where(valid, jnp.where(step_tile != prev_tile, 1, 2), 0).astype(jnp.int32)

    we_b = we.astype(jnp.bfloat16)
    be_f = be.astype(jnp.float32)

    out_sorted = pl.pallas_call(
        _moe_kernel,
        out_shape=jax.ShapeDtypeStruct((Np, D), jnp.float32),
        grid_spec=pltpu.PrefetchScalarGridSpec(
            num_scalar_prefetch=3,
            grid=(S,),
            in_specs=[
                # sorted tokens, bf16
                pl.BlockSpec((tm, D), lambda s, se, st, sm: (st[s], 0)),
                # this step's expert weight (D, D), bf16 (leading expert dim squeezed)
                pl.BlockSpec((None, D, D), lambda s, se, st, sm: (se[s], 0, 0)),
                # this step's expert bias (1, D), f32
                pl.BlockSpec((None, 1, D), lambda s, se, st, sm: (se[s], 0, 0)),
                # packed per-token [istar, wprob] for this tile, f32
                pl.BlockSpec((tm, 2), lambda s, se, st, sm: (st[s], 0)),
            ],
            out_specs=pl.BlockSpec((tm, D), lambda s, se, st, sm: (st[s], 0)),
        ),
        compiler_params=pltpu.CompilerParams(
            dimension_semantics=("arbitrary",)),   # output tiles are revisited/accumulated
    )(step_expert, step_tile, step_mode, xs, we_b, be_f, meta)

    # ---------- unsort back to the original token order ----------
    inv = jnp.zeros((Np,), jnp.int32).at[order].set(jnp.arange(Np, dtype=jnp.int32))
    out = out_sorted[inv[:N]]
    return out.reshape(B, T, D)


def topk_moe_ref(x, wr, br, we, be, *, k):
    """Pure-JAX f32 reference with identical semantics (last top-k expert wins)."""
    B, T, D = x.shape
    E = wr.shape[1]
    logits = jnp.einsum("btd,de->bte", x, wr) + br[0]
    probs = jax.nn.softmax(logits, axis=-1)
    _, topk_idx = lax.top_k(probs, k)
    mask = jnp.any(topk_idx[..., :, None] == jnp.arange(E), axis=-2)  # (B,T,E)
    istar = jnp.max(jnp.where(mask, jnp.arange(E), -1), axis=-1)      # (B,T)
    out = jnp.zeros_like(x)
    for e in range(E):
        y = x @ we[e] + be[e, 0]
        y = y * probs[..., e:e + 1]
        out = jnp.where((istar == e)[..., None], y, out)
    return out


if __name__ == "__main__":
    # Config: batch=2, n_ctx=8, d_model=32, n_experts=4, k=2
    B, T, D, E, K = 2, 8, 32, 4, 2

    key = jax.random.PRNGKey(0)
    kx, kwr, kbr, kwe, kbe = jax.random.split(key, 5)

    x = jax.random.normal(kx, (B, T, D), dtype=jnp.float32)
    # router Linear(d_model -> n_experts): weight stored as (D, E), bias (1, E)
    wr = jax.random.normal(kwr, (D, E), dtype=jnp.float32) * 0.1
    br = jax.random.normal(kbr, (1, E), dtype=jnp.float32) * 0.1
    # expert Linear(d_model -> d_model): weights stacked as (E, D, D), biases (E, 1, D)
    we = jax.random.normal(kwe, (E, D, D), dtype=jnp.float32) * 0.1
    be = jax.random.normal(kbe, (E, 1, D), dtype=jnp.float32) * 0.1

    out = topk_moe(x, wr, br, we, be, k=K)
    out = jax.block_until_ready(out)

    ref = topk_moe_ref(x, wr, br, we, be, k=K)
    assert out.shape == (B, T, D)
    # bf16 MXU inputs with f32 accumulation -> loosened tolerance vs f32 reference.
    assert jnp.allclose(out, ref, atol=2e-2, rtol=2e-2), "mismatch vs reference"

    print("KERNEL_OK")
</pallas_src>

<mosaic_0001>
module attributes {stable_mosaic.version = 11 : i64} {
  func.func @_moe_kernel(%arg0: i32, %arg1: memref<4xi32, #tpu.memory_space<smem>>, %arg2: memref<4xi32, #tpu.memory_space<smem>>, %arg3: memref<4xi32, #tpu.memory_space<smem>>, %arg4: memref<16x32xbf16, #tpu.memory_space<vmem>>, %arg5: memref<1x32x32xbf16, #tpu.memory_space<vmem>>, %arg6: memref<1x1x32xf32, #tpu.memory_space<vmem>>, %arg7: memref<16x2xf32, #tpu.memory_space<vmem>>, %arg8: memref<16x32xf32, #tpu.memory_space<vmem>>) attributes {dimension_semantics = [#tpu.dimension_semantics<arbitrary>], iteration_bounds = array<i64: 4>, scalar_prefetch = 3 : i64, scratch_operands = 0 : i64, tpu.core_type = #tpu.core_type<tc>, window_params = [{transform_indices = @transform_0, window_bounds = array<i64: 16, 32>}, {transform_indices = @transform_1, window_bounds = array<i64: 1, 32, 32>}, {transform_indices = @transform_2, window_bounds = array<i64: 1, 1, 32>}, {transform_indices = @transform_3, window_bounds = array<i64: 16, 2>}, {transform_indices = @transform_4, window_bounds = array<i64: 16, 32>}]} {
    %0 = arith.index_cast %arg0 : i32 to index
    %1 = memref.load %arg3[%0] : memref<4xi32, #tpu.memory_space<smem>>
    %c0_i32 = arith.constant 0 : i32
    %2 = arith.cmpi sgt, %1, %c0_i32 : i32
    %3 = arith.extui %2 : i1 to i32
    %c0_i32_0 = arith.constant 0 : i32
    %4 = arith.cmpi ne, %3, %c0_i32_0 : i32
    scf.if %4 {
      %c0 = arith.constant 0 : index
      %c0_1 = arith.constant 0 : index
      %5 = vector.load %arg4[%c0, %c0_1] : memref<16x32xbf16, #tpu.memory_space<vmem>>, vector<16x32xbf16>
      %c0_2 = arith.constant 0 : index
      %c0_3 = arith.constant 0 : index
      %c0_4 = arith.constant 0 : index
      %6 = vector.load %arg5[%c0_2, %c0_3, %c0_4] : memref<1x32x32xbf16, #tpu.memory_space<vmem>>, vector<1x32x32xbf16>
      %7 = vector.shape_cast %6 : vector<1x32x32xbf16> to vector<32x32xbf16>
      %cst = arith.constant dense<0.000000e+00> : vector<16x32xf32>
      %8 = tpu.matmul %5, %7, %cst {dimension_numbers = #tpu.dot_dimension_numbers<[1], [0], [0], [1], [0, 0, 1, 1], [], []>} : vector<16x32xbf16>, vector<32x32xbf16>, vector<16x32xf32> -> vector<16x32xf32>
      %c0_5 = arith.constant 0 : index
      %c0_6 = arith.constant 0 : index
      %c0_7 = arith.constant 0 : index
      %9 = vector.load %arg6[%c0_5, %c0_6, %c0_7] : memref<1x1x32xf32, #tpu.memory_space<vmem>>, vector<1x1x32xf32>
      %10 = vector.shape_cast %9 : vector<1x1x32xf32> to vector<1x32xf32>
      %11 = vector.broadcast %10 : vector<1x32xf32> to vector<16x32xf32>
      %12 = arith.addf %8, %11 : vector<16x32xf32>
      %13 = arith.index_cast %arg0 : i32 to index
      %14 = memref.load %arg1[%13] : memref<4xi32, #tpu.memory_space<smem>>
      %15 = arith.sitofp %14 : i32 to f32
      %c0_8 = arith.constant 0 : index
      %c0_9 = arith.constant 0 : index
      %16 = vector.load %arg7[%c0_8, %c0_9] : memref<16x2xf32, #tpu.memory_space<vmem>>, vector<16x1xf32>
      %17 = vector.broadcast %15 : f32 to vector<16x1xf32>
      %18 = arith.cmpf oeq, %16, %17 : vector<16x1xf32>
      %c0_10 = arith.constant 0 : index
      %c1 = arith.constant 1 : index
      %19 = vector.load %arg7[%c0_10, %c1] : memref<16x2xf32, #tpu.memory_space<vmem>>, vector<16x1xf32>
      %cst_11 = arith.constant 0.000000e+00 : f32
      %20 = vector.broadcast %cst_11 : f32 to vector<16x1xf32>
      %21 = arith.select %18, %19, %20 : vector<16x1xi1>, vector<16x1xf32>
      %22 = vector.broadcast %21 : vector<16x1xf32> to vector<16x32xf32>
      %23 = arith.mulf %12, %22 : vector<16x32xf32>
      %c1_i32 = arith.constant 1 : i32
      %24 = arith.cmpi eq, %1, %c1_i32 : i32
      %25 = arith.extui %24 : i1 to i32
      %c0_i32_12 = arith.constant 0 : i32
      %26 = arith.cmpi ne, %25, %c0_i32_12 : i32
      scf.if %26 {
        %c0_14 = arith.constant 0 : index
        %c0_15 = arith.constant 0 : index
        %30 = vector.load %arg8[%c0_14, %c0_15] : memref<16x32xf32, #tpu.memory_space<vmem>>, vector<16x32xf32>
        tpu.vector_store %arg8[%c0_14, %c0_15], %23 {strides = array<i32>} : memref<16x32xf32, #tpu.memory_space<vmem>>, vector<16x32xf32>,
      } else {
      }
      %c2_i32 = arith.constant 2 : i32
      %27 = arith.cmpi eq, %1, %c2_i32 : i32
      %28 = arith.extui %27 : i1 to i32
      %c0_i32_13 = arith.constant 0 : i32
      %29 = arith.cmpi ne, %28, %c0_i32_13 : i32
      scf.if %29 {
        %c0_14 = arith.constant 0 : index
        %c0_15 = arith.constant 0 : index
        %30 = vector.load %arg8[%c0_14, %c0_15] : memref<16x32xf32, #tpu.memory_space<vmem>>, vector<16x32xf32>
        %31 = arith.addf %30, %23 : vector<16x32xf32>
        %c0_16 = arith.constant 0 : index
        %c0_17 = arith.constant 0 : index
        %32 = vector.load %arg8[%c0_16, %c0_17] : memref<16x32xf32, #tpu.memory_space<vmem>>, vector<16x32xf32>
        tpu.vector_store %arg8[%c0_16, %c0_17], %31 {strides = array<i32>} : memref<16x32xf32, #tpu.memory_space<vmem>>, vector<16x32xf32>,
      } else {
      }
    } else {
    }
    return
  }
  func.func @transform_0(%arg0: i32, %arg1: memref<4xi32, #tpu.memory_space<smem>>, %arg2: memref<4xi32, #tpu.memory_space<smem>>, %arg3: memref<4xi32, #tpu.memory_space<smem>>) -> (i32, i32) {
    %0 = arith.index_cast %arg0 : i32 to index
    %1 = memref.load %arg2[%0] : memref<4xi32, #tpu.memory_space<smem>>
    %c0_i32 = arith.constant 0 : i32
    %c0_i32_0 = arith.constant 0 : i32
    return %1, %c0_i32 : i32, i32
  }
  func.func @transform_1(%arg0: i32, %arg1: memref<4xi32, #tpu.memory_space<smem>>, %arg2: memref<4xi32, #tpu.memory_space<smem>>, %arg3: memref<4xi32, #tpu.memory_space<smem>>) -> (i32, i32, i32) {
    %0 = arith.index_cast %arg0 : i32 to index
    %1 = memref.load %arg1[%0] : memref<4xi32, #tpu.memory_space<smem>>
    %c0_i32 = arith.constant 0 : i32
    %c0_i32_0 = arith.constant 0 : i32
    %c0_i32_1 = arith.constant 0 : i32
    return %1, %c0_i32, %c0_i32_0 : i32, i32, i32
  }
  func.func @transform_2(%arg0: i32, %arg1: memref<4xi32, #tpu.memory_space<smem>>, %arg2: memref<4xi32, #tpu.memory_space<smem>>, %arg3: memref<4xi32, #tpu.memory_space<smem>>) -> (i32, i32, i32) {
    %0 = arith.index_cast %arg0 : i32 to index
    %1 = memref.load %arg1[%0] : memref<4xi32, #tpu.memory_space<smem>>
    %c0_i32 = arith.constant 0 : i32
    %c0_i32_0 = arith.constant 0 : i32
    %c0_i32_1 = arith.constant 0 : i32
    return %1, %c0_i32, %c0_i32_0 : i32, i32, i32
  }
  func.func @transform_3(%arg0: i32, %arg1: memref<4xi32, #tpu.memory_space<smem>>, %arg2: memref<4xi32, #tpu.memory_space<smem>>, %arg3: memref<4xi32, #tpu.memory_space<smem>>) -> (i32, i32) {
    %0 = arith.index_cast %arg0 : i32 to index
    %1 = memref.load %arg2[%0] : memref<4xi32, #tpu.memory_space<smem>>
    %c0_i32 = arith.constant 0 : i32
    %c0_i32_0 = arith.constant 0 : i32
    return %1, %c0_i32 : i32, i32
  }
  func.func @transform_4(%arg0: i32, %arg1: memref<4xi32, #tpu.memory_space<smem>>, %arg2: memref<4xi32, #tpu.memory_space<smem>>, %arg3: memref<4xi32, #tpu.memory_space<smem>>) -> (i32, i32) {
    %0 = arith.index_cast %arg0 : i32 to index
    %1 = memref.load %arg2[%0] : memref<4xi32, #tpu.memory_space<smem>>
    %c0_i32 = arith.constant 0 : i32
    %c0_i32_0 = arith.constant 0 : i32
    return %1, %c0_i32 : i32, i32
  }
}

</mosaic_0001>

<bundles_post_ra>
// kernel: tpu_custom_call.1
= control target key start
LH: loop header
LB: loop body
LE: loop exit
PB: predicated region body
PF: predicated region fallthrough
CT: control target
= control target key end

     0   :  { %s832_s30 = smov [#allocation3]   ;;  %s833_s8 = smov [#allocation4]   ;;  %s1103_s0 = inlined_call_operand.vmem [shape: s32[4], index: 0, kind: input, shape index: {}]   ;;  %s1104_s3 = inlined_call_operand.vmem [shape: bf16[16,32], index: 3, kind: input, shape index: {}]   ;;  %s1105_s4 = inlined_call_operand.hbm [shape: bf16[4,32,32], index: 4, kind: input, shape index: {}]   ;;  %s1106_s5 = inlined_call_operand.vmem [shape: f32[4,1,32], index: 5, kind: input, shape index: {}]   ;;  %s1107_s6 = inlined_call_operand.vmem [shape: f32[16,2], index: 6, kind: input, shape index: {}]   ;;  %s1108_s7 = inlined_call_operand.hbm [shape: f32[16,32], index: 7, kind: output, shape index: {}]   ;;  %s1109_s1 = inlined_call_operand.vmem [shape: s32[4], index: 1, kind: input, shape index: {}]   ;;  %s1110_s2 = inlined_call_operand.vmem [shape: s32[4], index: 2, kind: input, shape index: {}]  }
   0x1   :  { %s13_s26 = sshll.u32 %s1103_s0, 4  ;;  %s18_s29 = sshll.u32 %s1109_s1, 4  ;;  %s14_s26 = int_to_ptr.vmem [resolvable:$true] %s13_s26  ;;  %s19_s29 = int_to_ptr.vmem [resolvable:$true] %s18_s29 }
   0x2   :  { %16 = dma.vmem_to_smem %s14_s26, 16, %s832_s30, [#allocation2] }
   0x3   :  { %21 = dma.vmem_to_smem %s19_s29, 16, %s833_s8, [#allocation2] }
   0x4   :  { %s23_s11 = sshll.u32 %s1110_s2, 4  ;;  %s834_s12 = smov [#allocation5]   ;;  %s24_s11 = int_to_ptr.vmem [resolvable:$true] %s23_s11 }
   0x5   :  { %26 = dma.vmem_to_smem %s24_s11, 16, %s834_s12, [#allocation2] }
   0x6   :  { %794 = dma.done.wait [#allocation2], 48 }
   0x7   :  { %795 = vsyncadd [#allocation2], 4294967248 }
   0x8   :  { %29 = sfence }
   0x9   :  { %30 = vsyncpa [#allocation7], 0 }
   0xa   :  { %32 = vsyncpa [#allocation7 + $0x1], 0 }
   0xb   :  { %33 = vsyncpa [#allocation8], 0 }
   0xc   :  { %35 = vsyncpa [#allocation8 + $0x1], 0  ;;  %s890_s0 = smov 0   ;;  %s892_s1 = smov 0  }
   0xd   :  { %s894_s13 = smov 0   ;;  %s896_s14 = smov 0  }
   0xe   :  { %s898_s15 = smov 0   ;;  %s900_s2 = smov 0  }
   0xf   :  { %s902_s16 = smov 0  }
  0x10 LB: > { %1114 = sst [smem:[#allocation16_spill]] %s814_s13  ;;  %s924_s17 = sadd.s32 4294967295, %s830_s16   ;;  %s830_s16 = sphi %s902_s16, %s1133_s16   ;;  %s826_s2 = sphi %s900_s2, %s1128_s2   ;;  %s822_s15 = sphi %s898_s15, %s1132_s15   ;;  %s818_s14 = sphi %s896_s14, %s1131_s14   ;;  %s814_s13 = sphi %s894_s13, %s1126_s13   ;;  %s810_s1 = sphi %s892_s1, %s1130_s1   ;;  %s806_s0 = sphi %s890_s0, %s1129_s0  }
  0x11   : > { %1115 = sst [smem:[#allocation17_spill]] %s826_s2  ;;  %s545_s18 = sadd.s32 4294967294, %s830_s16  }
  0x12   : > { %s928_s19 = sadd.s32 1, %s830_s16   ;;  %s73_s20 = sld [smem:[#allocation3 + %s830_s16]] }
  0x13   : > { %s74_s21 = sld [smem:[#allocation3 + %s928_s19]]  ;;  %s78_s22 = sadd.s32 1, %s826_s2 }
  0x14   : > { %p85_p0 = scmp.ne.s32.totalorder %s826_s2, %s822_s15  ;;  %p86_p1 = scmp.eq.s32.totalorder %s830_s16, 0 }
  0x15   : > { %p91_p2 = scmp.ne.s32.totalorder %s822_s15, %s818_s14  ;;  %p92_p3 = scmp.eq.s32.totalorder %s924_s17, 0 }
  0x16   : > { %p938_p4 = por %p86_p1, %p85_p0  ;;  %s157_s24 = sld [smem:[#allocation4 + %s830_s16]] }
  0x17   : > { %p943_p5 = por %p92_p3, %p91_p2  ;;  %s158_s26 = sld [smem:[#allocation4 + %s928_s19]] }
  0x18   : > { %s162_s27 = sadd.s32 1, %s814_s13  ;;  %p172_p6 = scmp.ne.s32.totalorder %s814_s13, %s810_s1 }
  0x19   : > { %s75_s28 = ssub.s32 %s73_s20, %s74_s21  ;;  %p173_p7 = scmp.eq.s32.totalorder %s924_s17, 3 }
  0x1a   : > { %p76_p8 = scmp.eq.s32.totalorder %s75_s28, 0  ;;  %p178_p9 = scmp.ne.s32.totalorder %s810_s1, %s806_s0 }
  0x1b   : > { %p954_p10 = por %p173_p7, %p172_p6  ;;  %p179_p11 = scmp.eq.s32.totalorder %s545_s18, 3 }
  0x1c   : > { %s959_s30 = scalar_select %p76_p8, %s826_s2, %s78_s22  }
  0x1d   : > { %s159_s8 = ssub.s32 %s157_s24, %s158_s26  ;;  %p961_p12 = por %p179_p11, %p178_p9 }
  0x1e   : > { %1119 = sst [smem:[#allocation18_spill]] %s959_s30  ;;  %p160_p13 = scmp.eq.s32.totalorder %s159_s8, 0 }
  0x1f   : > { %p602_p0 = scmp.lt.s32.totalorder %s830_s16, 4  ;;  %s210_s10 = sand.u32 1, %s826_s2  }
  0x20   : > { %s968_s11 = scalar_select %p160_p13, %s814_s13, %s162_s27  }
  0x21   : > { %s548_s12 = sshll.u32 %s210_s10, 4  ;;  %p972_p1 = pnand %p602_p0, %p938_p4 }
  0x22   : > { %1121 = sst [smem:[#allocation19_spill]] %s968_s11  ;;  %s214_s22 = scalar_lea.vmem [#allocation6], %s548_s12 }
  0x23   : > { %s584_s18 = scalar_select %p938_p4, [#allocation3], [#allocation10] }
  0x24   : > { %s585_s20 = scalar_select %p938_p4, %s830_s16, 0 }
  0x25   : > { %s1135_s18 = smov (!%p602_p0, %s584_s18), [#allocation12]  ;;  %s981_s24 = sshll.u32 %s214_s22, 4  ;;  %s224_s24 = int_to_ptr.vmem [resolvable:$true] %s981_s24 }
  0x26   : > { %s1137_s20 = smov (!%p602_p0, %s585_s20), 0  ;;  %p551_p2 = scmp.ge.s32.totalorder %s830_s16, 1 }
  0x27   : > { %s215_s21 = sld [smem:[%s1135_s18 + %s1137_s20]]  ;;  %p250_p3 = scmp.lt.s32.totalorder %s830_s16, 5 }
  0x28   : > { %s211_s18 = scalar_lea.sflag [#allocation7], %s210_s10  ;;  %p712_p7 = pneg %p972_p1 }
  0x29   : > { %p985_p6 = pnand %p551_p2, %p250_p3  ;;  %s715_s11 = scalar_lea.hbm %s1105_s4, 64 }
  0x2d   : > { %s579_s27 = sshll.u32 %s215_s21, 4 }
  0x2e   : > { %s220_s23 = scalar_lea.hbm %s1105_s4, %s579_s27 }
  0x2f   : > { %s221_s30 = sshll.u32 %s220_s23, 4  ;;  %s222_s30 = int_to_ptr.hbm [resolvable:$true] %s221_s30 }
  0x30   : > { %s708_s20 = sshra.s32 %s222_s30, 4  ;;  %s709_s20 = int_to_ptr.hbm [resolvable:$true] %s708_s20 }
  0x31   : > { %s710_s12 = scalar_lea.hbm %s709_s20, 16  ;;  %p716_p11 = scmp.lt.s32.totalorder %s709_s20, %s1105_s4 }
  0x32   : > { %p711_p4 = scmp.ne.s32.totalorder %s709_s20, %s710_s12  ;;  %p717_p13 = scmp.lt.s32.totalorder %s715_s11, %s710_s12 }
  0x34   : > { %p713_p8 = pnand %p712_p7, %p711_p4  ;;  %p718_p0 = por %p717_p13, %p716_p11 }
  0x36   : > { %p714_p9 = pneg %p713_p8 }
  0x38   : > { %p719_p2 = pnand %p718_p0, %p714_p9 }
  0x3a   : > { %722 = shalt.err (!%p719_p2)
}
  0x3b   : > { %s835_s10 = smov 64   ;;  %s836_s27 = smov 4  }
  0x3c   : > { %597 = dma.hbm_to_vmem [thread:$0]  (!%p972_p1), %s222_s30, 256, %s224_s24, %s211_s18, %s835_s10, %s835_s10, %s836_s27  }
  0x3d   : > { %254 = sbr.rel (%p985_p6) target bundleno = 365 (0x16d), region = 36  ;;  %s256_s2 = sand.u32 (!%p985_p6), 1, %s822_s15  }
  0x3e   : > { %s1006_s28 = sshll.u32 (!%p985_p6), %s256_s2, 4  ;;  %s257_s13 = scalar_lea.sflag (!%p985_p6), [#allocation7], %s256_s2 }
  0x3f   : > { %s260_s8 = scalar_lea.vmem (!%p985_p6), [#allocation6], %s1006_s28 }
  0x42   : > { %797 = dma.done.wait (%p943_p5), %s257_s13, 256  }
  0x43   : > { %799 = vsyncadd (%p943_p5), %s257_s13, 4294967040  ;;  %s1113_s30 = sand.u32 1, %s810_s1   ;;  %s302_s11 = sld [smem:[#allocation4 + %s924_s17]] }
  0x44   : > { %s553_s14 = sshll.u32 %s1113_s30, 4  ;;  %s311_s24 = sld [smem:[#allocation3 + %s924_s17]] }
  0x45   : > { %s316_s26 = sld [smem:[#allocation4 + %s924_s17]]  ;;  %s1034_s30 = scalar_lea.vmem [#allocation9], %s553_s14 }
  0x46   : > { %s1020_s23 = sld [smem:[#allocation5 + %s924_s17]] }
  0x49   : > { %s554_s18 = sshll.u32 %s302_s11, 1 }
  0x4a   : > { %p304_p1 = scmp.lt.s32.totalorder %s554_s18, 1  ;;  %p312_p3 = scmp.lt.s32.totalorder %s311_s24, 3 }
  0x4b   : > { %s556_s20 = sshll.u32 %s316_s26, 1 }
  0x4c   : > { %s1139_s18 = smov (!%p304_p1, %s554_s18), 1  ;;  %s1141_s24 = smov (!%p312_p3, %s311_s24), 3 }
  0x4d   : > { %s555_s25 = sshll.u32 %s1139_s18, 2  ;;  %p318_p5 = scmp.lt.s32.totalorder %s556_s20, 1 }
  0x4e   : > { %s307_s21 = scalar_lea.vmem %s1104_s3, %s555_s25  ;;  %s314_s2 = scalar_lea.vmem %s1106_s5, %s1141_s24 }
  0x4f   : > { %s1143_s20 = smov (!%p318_p5, %s556_s20), 1  ;;  %p558_p6 = scmp.le.s32.totalorder %s1020_s23, 0 }
  0x50   : > { %s557_s28 = sshll.u32 %s1143_s20, 3  ;;  %s837_s18 = smov (!%p558_p6), 127  }
  0x51   : > { %s321_s26 = scalar_lea.vmem %s1107_s6, %s557_s28  ;;  %331 = sbr.rel (%p558_p6) target bundleno = 341 (0x155), region = 44 }
  0x52   : > { %s377_s14 = sld [smem:[#allocation3 + %s924_s17]] (!%p558_p6)  ;;  %p572_p4 = scmp.ne.s32.totalorder (!%p558_p6), %s1020_s23, 1 }
  0x56   : > { %v379_v0 = vld [vmem:[%s321_s26] sm:$0xff]  ;;  %v582_v1 = vld [vmem:[%s260_s8 + $0x8] sm:$0xff]  ;;  %vm359_vm0 = vcmask 261120   ;;  %v838_v5 = vmov 0  }
  0x57   : > { %386 = vrot.lane.b32.xlu0 %v379_v0, %s837_s18  ;;  %369 = vmatpush.bf16.msra.mxu0 %v582_v1  ;;  %v581_v2 = vld [vmem:[%s260_s8] sm:$0xff]  ;;  %v380_v4 = vld [vmem:[%s321_s26 + $0x8] sm:$0xff] }
  0x58   : > { %v580_v3 = vld [vmem:[%s307_s21] sm:$0xff]  ;;  %669 = vset.pattern.permute.xlu1 %v838_v5  ;;  %670 = vset.pattern.permute.xlu0 %v838_v5  ;;  %s378_s20 = scvt.s32.f32 %s377_s14 }
  0x59   : > { %v671_v11 = vld [vmem:[%s314_s2] ss:$0 sm:$0xff] }
  0x5a   : > { %v381_v6 = vstv %s378_s20 }
  0x5b   : > { %370 = vmatpush.bf16.msra.mxu0 %v581_v2  ;;  %vm382_vm1 = vcmp.eq.f32.partialorder %v379_v0, %v381_v6  ;;  %vm383_vm2 = vcmp.eq.f32.partialorder %v380_v4, %v381_v6 }
  0x5e   : > { %571 = vmatmul.msk.bf16.vlgmr.msra.gmra.mxu0 %vm359_vm0, %v580_v3 }
  0x5f   : > { %388 = vrot.lane.b32.xlu0 %v380_v4, %s837_s18 }
  0xc9   : > { %v387_v7 = vpop.permute.xlu0 %386 }
  0xca   : > { %v392_v8 = vsel %vm382_vm1, %v387_v7, 0.0 }
  0xcb   : > { %396 = vperm.xlu1 %669, %v392_v8  }
  0xd1   : > { %v389_v9 = vpop.permute.xlu0 %388 }
  0xd2   : > { %v393_v10 = vsel %vm383_vm2, %v389_v9, 0.0 }
  0xd3   : > { %401 = vperm.xlu1 %669, %v393_v10  }
  0xdb   : > { %v372_v12 = vpop.f32.mrf.mxu0 }
  0xdc   : > { %v373_v13 = vadd.f32 %v671_v11, %v372_v12 }
  0xe3   : > { %v374_v16 = vpop.f32.mrf.mxu0 }
  0xe4   : > { %v375_v17 = vadd.f32 %v671_v11, %v374_v16 }
 0x13d   : > { %v397_v14 = vpop.permute.xlu1 %396 }
 0x13e   : > { %v404_v15 = vmul.f32 %v397_v14, %v373_v13 }
 0x142   : > { %409 = sbr.rel (%p572_p4) target bundleno = 329 (0x149), region = 48 }
 0x145   : > { %v402_v18 = vpop.permute.xlu1 %401 }
 0x146   : > { %v405_v19 = vmul.f32 %v402_v18, %v375_v17 }
 0x147   : > { %410 = vst.msk [vmem:[%s1034_s30] sm:$0xff] %vm359_vm0, %v404_v15 }
 0x148   : > { %411 = vst.msk [vmem:[%s1034_s30 + $0x8] sm:$0xff] %vm359_vm0, %v405_v19 }
 0x149 PF: > { %p573_p7 = scmp.ne.s32.totalorder %s1020_s23, 2 }
 0x14b   : > { %415 = sbr.rel (%p573_p7) target bundleno = 341 (0x155), region = 52 }
 0x150   : > { %v416_v20 = vld [vmem:[%s1034_s30] sm:$0xff]  ;;  %v417_v21 = vld [vmem:[%s1034_s30 + $0x8] sm:$0xff] }
 0x151   : > { %v418_v22 = vadd.f32 %v416_v20, %v404_v15  ;;  %v419_v23 = vadd.f32 %v417_v21, %v405_v19 }
 0x153   : > { %420 = vst.msk [vmem:[%s1034_s30] sm:$0xff] %vm359_vm0, %v418_v22 }
 0x154   : > { %421 = vst.msk [vmem:[%s1034_s30 + $0x8] sm:$0xff] %vm359_vm0, %v419_v23 }
 0x155 PF: > { %s588_s24 = scalar_select %p954_p10, [#allocation4], [#allocation11] }
 0x156   : > { %s1145_s17 = smov (!%p954_p10, %s924_s17), 0  ;;  %s436_s12 = sshll.u32 %s1034_s30, 4  ;;  %s437_s12 = int_to_ptr.vmem [resolvable:$true] %s436_s12 }
 0x157   : > { %s430_s23 = sld [smem:[%s588_s24 + %s1145_s17]]  ;;  %s1124_s28 = sand.u32 1, %s810_s1  }
 0x158   : > { %s423_s13 = scalar_lea.sflag [#allocation8], %s1124_s28  ;;  %s758_s30 = scalar_lea.hbm %s1108_s7, 16 }
 0x15d   : > { %s583_s22 = sshll.u32 %s430_s23, 4 }
 0x15e   : > { %s435_s27 = scalar_lea.hbm %s1108_s7, %s583_s22 }
 0x15f   : > { %s438_s2 = sshll.u32 %s435_s27, 4  ;;  %s439_s2 = int_to_ptr.hbm [resolvable:$true] %s438_s2 }
 0x160   : > { %s752_s11 = sshra.s32 %s439_s2, 4  ;;  %s753_s11 = int_to_ptr.hbm [resolvable:$true] %s752_s11 }
 0x161   : > { %s754_s26 = scalar_lea.hbm %s753_s11, 16  ;;  %p759_p13 = scmp.lt.s32.totalorder %s753_s11, %s1108_s7 }
 0x162   : > { %p755_p8 = scmp.ne.s32.totalorder %s753_s11, %s754_s26  ;;  %p760_p0 = scmp.lt.s32.totalorder %s758_s30, %s754_s26 }
 0x164   : > { %p756_p9 = pnand %p755_p8, %p954_p10  ;;  %p761_p2 = por %p760_p0, %p759_p13 }
 0x166   : > { %p757_p11 = pneg %p756_p9 }
 0x168   : > { %p762_p1 = pnand %p761_p2, %p757_p11 }
 0x16a   : > { %765 = shalt.err (!%p762_p1)
}
 0x16b   : > { %s839_s8 = smov 128   ;;  %s840_s25 = smov 8  }
 0x16c   : > { %590 = dma.vmem_to_hbm [thread:$0]  (%p954_p10), %s437_s12, 256, %s439_s2, %s423_s13, %s839_s8, %s839_s8, %s840_s25  }
 0x16d PF: > { %p603_p3 = scmp.ge.s32.totalorder %s830_s16, 2  ;;  %s453_s24 = sand.u32 1, %s806_s0  }
 0x16e   : > { %s454_s23 = scalar_lea.sflag [#allocation8], %s453_s24 }
 0x16f   : > { %p599_p5 = pnand %p603_p3, %p961_p12 }
 0x171   : > { %p600_p6 = pneg %p599_p5 }
 0x173   : > { %801 = dma.done.wait (%p600_p6), %s454_s23, 256  }
 0x174   : > { %803 = vsyncadd (%p600_p6), %s454_s23, 4294967040  ;;  %s1125_s22 = sld [smem:[#allocation16_spill]]  ;;  %p38_p10 = scmp.ge.s32.totalorder %s928_s19, 6  }
 0x175   : > { %s1126_s13 = sld [smem:[#allocation19_spill]]  ;;  %s1129_s0 = smov %s810_s1 }
 0x176   : > { %s1127_s21 = sld [smem:[#allocation17_spill]]  ;;  %s1131_s14 = smov %s822_s15 }
 0x177   : > { %s1128_s2 = sld [smem:[#allocation18_spill]]  ;;  %s1133_s16 = smov %s928_s19 }
 0x178   :  { %40 = sbr.rel (!%p38_p10) target bundleno = 16 (0x10), region = 102 }
 0x17a   : > { %s1130_s1 = smov %s1125_s22 }
 0x17c   : > { %s1132_s15 = smov %s1127_s21 }
 0x17d   :  { %460 = vsyncpa [#allocation7], 1 }
 0x17e   :  { %462 = vsyncpa [#allocation7 + $0x1], 1 }
 0x17f   :  { %463 = vsyncpa [#allocation8], 1 }
 0x180   :  { %465 = vsyncpa [#allocation8 + $0x1], 1 }

</bundles_post_ra>
